<compile_context>
chip_gen: v5e
topology: v5e:2x2
jax: 0.10.0
libtpu: 0.0.40
codegen_flags: <defaults>
</compile_context>

<pallas_src>
import math
import functools

import jax
import jax.numpy as jnp
from jax import lax
from jax.experimental import pallas as pl
from jax.experimental.pallas import tpu as pltpu


def _flash_attention_head_kernel(xq_ref, xkv_ref, mask_ref,
                                 wq_ref, bq_ref, wkv_ref, bkv_ref,
                                 o_ref,
                                 m_scr, l_scr, q_scr, acc_scr,
                                 *, inv_scale, dim_out, compute_dtype):
    # xq_ref:   (1, tq,  Din)   rows of x for this query tile
    # xkv_ref:  (1, tkv, Din)   rows of x for this key/value tile
    # mask_ref: (1, tq,  tkv)   int8, nonzero == masked out
    # wq_ref:   (Din, Dout)   bq_ref:  (1, Dout)
    # wkv_ref:  (Din, 2*Dout) bkv_ref: (1, 2*Dout)   (wk | wv packed)
    # o_ref:    (1, tq, Dout)
    kv = pl.program_id(2)

    @pl.when(kv == 0)
    def _init():
        # Project Q once per (batch, q-tile); fold 1/sqrt(S) into it.
        xq = xq_ref[0].astype(compute_dtype)
        q = jnp.dot(xq, wq_ref[...].astype(compute_dtype),
                    preferred_element_type=jnp.float32) + bq_ref[...]
        q_scr[...] = q * inv_scale
        m_scr[...] = jnp.full_like(m_scr, -jnp.inf)
        l_scr[...] = jnp.zeros_like(l_scr)
        acc_scr[...] = jnp.zeros_like(acc_scr)

    # Fused K/V projection: one (tkv, Din) @ (Din, 2*Dout) matmul.
    xkv = xkv_ref[0].astype(compute_dtype)
    kvp = jnp.dot(xkv, wkv_ref[...].astype(compute_dtype),
                  preferred_element_type=jnp.float32) + bkv_ref[...]
    k = kvp[:, :dim_out]
    v = kvp[:, dim_out:]

    # scores: (tq, tkv) — contract feature dims directly, no k.T materialized.
    s = lax.dot_general(q_scr[...].astype(compute_dtype), k.astype(compute_dtype),
                        dimension_numbers=(((1,), (1,)), ((), ())),
                        preferred_element_type=jnp.float32)
    s = jnp.where(mask_ref[0] != 0, jnp.float32(-1e9), s)

    # Online (flash) softmax update.
    m_prev = m_scr[...]
    m_new = jnp.maximum(m_prev, jnp.max(s, axis=-1, keepdims=True))
    alpha = jnp.exp(m_prev - m_new)
    p = jnp.exp(s - m_new)
    l_scr[...] = alpha * l_scr[...] + jnp.sum(p, axis=-1, keepdims=True)
    acc_scr[...] = alpha * acc_scr[...] + jnp.dot(
        p.astype(compute_dtype), v.astype(compute_dtype),
        preferred_element_type=jnp.float32)
    m_scr[...] = m_new

    @pl.when(kv == pl.num_programs(2) - 1)
    def _finalize():
        inv_l = pl.reciprocal(l_scr[...], approx=True)   # EUP slot, ~free
        o_ref[0] = (acc_scr[...] * inv_l).astype(o_ref.dtype)


def _pick_tile(dim, target, align):
    """Largest multiple of `align` <= target that divides `dim`, else full dim."""
    if dim <= target:
        return dim
    t = (target // align) * align
    while t >= align:
        if dim % t == 0:
            return t
        t -= align
    return dim


def attention_head(x, mask, wq, bq, wk, bk, wv, bv,
                   *, q_tile=256, kv_tile=512, compute_dtype=jnp.float32):
    """x: (B, S, Din) f32, mask: (B, S, S) bool-ish (True == mask out),
    weights (Din, Dout), biases (Dout,).  Returns (B, S, Dout)."""
    B, S, Din = x.shape
    Dout = wq.shape[1]

    # Tiles sized for the tightest VMEM budget (v7x); full-S fallback for tiny S.
    tq = _pick_tile(S, q_tile, 8)      # second-last dim: multiple of 8 (or full)
    tkv = _pick_tile(S, kv_tile, 128)  # last dim of mask block: mult of 128 (or full)
    n_q = S // tq
    n_kv = S // tkv

    mask_i8 = mask.astype(jnp.int8)                       # 4x smaller HBM stream vs int32
    wkv = jnp.concatenate([wk, wv], axis=1)               # (Din, 2*Dout)
    bq2 = bq.reshape(1, Dout).astype(jnp.float32)
    bkv2 = jnp.concatenate([bk, bv]).reshape(1, 2 * Dout).astype(jnp.float32)

    inv_scale = 1.0 / math.sqrt(float(S))                 # matches query.size(1) ** 0.5

    kernel = functools.partial(
        _flash_attention_head_kernel,
        inv_scale=inv_scale, dim_out=Dout, compute_dtype=compute_dtype)

    const = lambda b, qi, ki: (0, 0)                      # weights stay VMEM-resident

    return pl.pallas_call(
        kernel,
        out_shape=jax.ShapeDtypeStruct((B, S, Dout), x.dtype),
        grid_spec=pltpu.PrefetchScalarGridSpec(
            num_scalar_prefetch=0,
            grid=(B, n_q, n_kv),
            in_specs=[
                pl.BlockSpec((1, tq, Din), lambda b, qi, ki: (b, qi, 0)),   # x rows for Q
                pl.BlockSpec((1, tkv, Din), lambda b, qi, ki: (b, ki, 0)),  # x rows for K/V
                pl.BlockSpec((1, tq, tkv), lambda b, qi, ki: (b, qi, ki)),  # mask (int8)
                pl.BlockSpec((Din, Dout), const),                           # wq
                pl.BlockSpec((1, Dout), const),                             # bq
                pl.BlockSpec((Din, 2 * Dout), const),                       # wk|wv
                pl.BlockSpec((1, 2 * Dout), const),                         # bk|bv
            ],
            out_specs=pl.BlockSpec((1, tq, Dout), lambda b, qi, ki: (b, qi, 0)),
            scratch_shapes=[
                pltpu.VMEM((tq, 1), jnp.float32),     # running max m
                pltpu.VMEM((tq, 1), jnp.float32),     # running denom l
                pltpu.VMEM((tq, Dout), jnp.float32),  # pre-scaled Q tile
                pltpu.VMEM((tq, Dout), jnp.float32),  # output accumulator
            ],
        ),
        compiler_params=pltpu.CompilerParams(
            dimension_semantics=("parallel", "parallel", "arbitrary"),
            vmem_limit_bytes=32 * 1024 * 1024,
        ),
    )(x, x, mask_i8, wq, bq2, wkv, bkv2)


def attention_head_ref(x, mask, wq, bq, wk, bk, wv, bv):
    q = x @ wq + bq
    k = x @ wk + bk
    v = x @ wv + bv
    scale = math.sqrt(float(x.shape[1]))
    scores = jnp.einsum("bsd,btd->bst", q, k) / scale
    scores = jnp.where(mask, -1e9, scores)
    attn = jax.nn.softmax(scores, axis=-1)
    return jnp.einsum("bst,btd->bsd", attn, v)


if __name__ == "__main__":
    B, S, DIM_INP, DIM_OUT = 2, 8, 32, 32

    key = jax.random.PRNGKey(0)
    kx, km, k1, k2, k3, k4, k5, k6 = jax.random.split(key, 8)

    x = jax.random.normal(kx, (B, S, DIM_INP), dtype=jnp.float32)
    # random boolean mask: True means "mask out"
    attention_mask = jax.random.bernoulli(km, 0.3, (B, S, S))

    # deterministic synthetic Linear params (PyTorch nn.Linear: y = x @ W.T + b;
    # here we store W already transposed as (Din, Dout)).
    bound = 1.0 / math.sqrt(DIM_INP)
    wq = jax.random.uniform(k1, (DIM_INP, DIM_OUT), jnp.float32, -bound, bound)
    bq = jax.random.uniform(k2, (DIM_OUT,), jnp.float32, -bound, bound)
    wk = jax.random.uniform(k3, (DIM_INP, DIM_OUT), jnp.float32, -bound, bound)
    bk = jax.random.uniform(k4, (DIM_OUT,), jnp.float32, -bound, bound)
    wv = jax.random.uniform(k5, (DIM_INP, DIM_OUT), jnp.float32, -bound, bound)
    bv = jax.random.uniform(k6, (DIM_OUT,), jnp.float32, -bound, bound)

    out = attention_head(x, attention_mask, wq, bq, wk, bk, wv, bv)
    out = jax.block_until_ready(out)

    ref = attention_head_ref(x, attention_mask, wq, bq, wk, bk, wv, bv)
    assert out.shape == (B, S, DIM_OUT)
    # tolerance accommodates the EUP approx-reciprocal softmax normalization
    assert jnp.allclose(out, ref, atol=2e-3, rtol=2e-3), "mismatch vs reference"

    print("KERNEL_OK")
</pallas_src>

<mosaic_0001>
module attributes {stable_mosaic.version = 11 : i64} {
  func.func @_flash_attention_head_kernel(%arg0: i32, %arg1: i32, %arg2: i32, %arg3: memref<1x8x32xf32, #tpu.memory_space<vmem>>, %arg4: memref<1x8x32xf32, #tpu.memory_space<vmem>>, %arg5: memref<1x8x8xi8, #tpu.memory_space<vmem>>, %arg6: memref<32x32xf32, #tpu.memory_space<vmem>>, %arg7: memref<1x32xf32, #tpu.memory_space<vmem>>, %arg8: memref<32x64xf32, #tpu.memory_space<vmem>>, %arg9: memref<1x64xf32, #tpu.memory_space<vmem>>, %arg10: memref<1x8x32xf32, #tpu.memory_space<vmem>>, %arg11: memref<8x1xf32, #tpu.memory_space<vmem>>, %arg12: memref<8x1xf32, #tpu.memory_space<vmem>>, %arg13: memref<8x32xf32, #tpu.memory_space<vmem>>, %arg14: memref<8x32xf32, #tpu.memory_space<vmem>>) attributes {dimension_semantics = [#tpu.dimension_semantics<parallel>, #tpu.dimension_semantics<parallel>, #tpu.dimension_semantics<arbitrary>], iteration_bounds = array<i64: 2, 1, 1>, scalar_prefetch = 0 : i64, scratch_operands = 4 : i64, tpu.core_type = #tpu.core_type<tc>, window_params = [{transform_indices = @transform_0, window_bounds = array<i64: 1, 8, 32>}, {transform_indices = @transform_1, window_bounds = array<i64: 1, 8, 32>}, {transform_indices = @transform_2, window_bounds = array<i64: 1, 8, 8>}, {pipeline_mode = #tpu.pipeline_mode<synchronous>, transform_indices = @transform_3, window_bounds = array<i64: 32, 32>}, {pipeline_mode = #tpu.pipeline_mode<synchronous>, transform_indices = @transform_4, window_bounds = array<i64: 1, 32>}, {pipeline_mode = #tpu.pipeline_mode<synchronous>, transform_indices = @transform_5, window_bounds = array<i64: 32, 64>}, {pipeline_mode = #tpu.pipeline_mode<synchronous>, transform_indices = @transform_6, window_bounds = array<i64: 1, 64>}, {transform_indices = @transform_7, window_bounds = array<i64: 1, 8, 32>}]} {
    %c0_i32 = arith.constant 0 : i32
    %0 = arith.cmpi eq, %arg2, %c0_i32 : i32
    %1 = arith.extui %0 : i1 to i32
    %c0_i32_0 = arith.constant 0 : i32
    %2 = arith.cmpi ne, %1, %c0_i32_0 : i32
    scf.if %2 {
      %c0_31 = arith.constant 0 : index
      %c0_32 = arith.constant 0 : index
      %c0_33 = arith.constant 0 : index
      %45 = vector.load %arg3[%c0_31, %c0_32, %c0_33] : memref<1x8x32xf32, #tpu.memory_space<vmem>>, vector<1x8x32xf32>
      %46 = vector.shape_cast %45 : vector<1x8x32xf32> to vector<8x32xf32>
      %c0_34 = arith.constant 0 : index
      %c0_35 = arith.constant 0 : index
      %47 = vector.load %arg6[%c0_34, %c0_35] : memref<32x32xf32, #tpu.memory_space<vmem>>, vector<32x32xf32>
      %cst_36 = arith.constant dense<0.000000e+00> : vector<8x32xf32>
      %48 = tpu.matmul %46, %47, %cst_36 {dimension_numbers = #tpu.dot_dimension_numbers<[1], [0], [0], [1], [0, 0, 1, 1], [], []>} : vector<8x32xf32>, vector<32x32xf32>, vector<8x32xf32> -> vector<8x32xf32>
      %c0_37 = arith.constant 0 : index
      %c0_38 = arith.constant 0 : index
      %49 = vector.load %arg7[%c0_37, %c0_38] : memref<1x32xf32, #tpu.memory_space<vmem>>, vector<1x32xf32>
      %50 = vector.broadcast %49 : vector<1x32xf32> to vector<8x32xf32>
      %51 = arith.addf %48, %50 : vector<8x32xf32>
      %cst_39 = arith.constant 0.353553385 : f32
      %52 = vector.broadcast %cst_39 : f32 to vector<8x32xf32>
      %53 = arith.mulf %51, %52 : vector<8x32xf32>
      %c0_40 = arith.constant 0 : index
      %c0_41 = arith.constant 0 : index
      %54 = vector.load %arg13[%c0_40, %c0_41] : memref<8x32xf32, #tpu.memory_space<vmem>>, vector<8x32xf32>
      tpu.vector_store %arg13[%c0_40, %c0_41], %53 {strides = array<i32>} : memref<8x32xf32, #tpu.memory_space<vmem>>, vector<8x32xf32>,
      %cst_42 = arith.constant 0xFF800000 : f32
      %55 = vector.broadcast %cst_42 : f32 to vector<8x1xf32>
      %c0_43 = arith.constant 0 : index
      %c0_44 = arith.constant 0 : index
      %56 = vector.load %arg11[%c0_43, %c0_44] : memref<8x1xf32, #tpu.memory_space<vmem>>, vector<8x1xf32>
      tpu.vector_store %arg11[%c0_43, %c0_44], %55 {strides = array<i32>} : memref<8x1xf32, #tpu.memory_space<vmem>>, vector<8x1xf32>,
      %cst_45 = arith.constant 0.000000e+00 : f32
      %57 = vector.broadcast %cst_45 : f32 to vector<8x1xf32>
      %c0_46 = arith.constant 0 : index
      %c0_47 = arith.constant 0 : index
      %58 = vector.load %arg12[%c0_46, %c0_47] : memref<8x1xf32, #tpu.memory_space<vmem>>, vector<8x1xf32>
      tpu.vector_store %arg12[%c0_46, %c0_47], %57 {strides = array<i32>} : memref<8x1xf32, #tpu.memory_space<vmem>>, vector<8x1xf32>,
      %cst_48 = arith.constant 0.000000e+00 : f32
      %59 = vector.broadcast %cst_48 : f32 to vector<8x32xf32>
      %c0_49 = arith.constant 0 : index
      %c0_50 = arith.constant 0 : index
      %60 = vector.load %arg14[%c0_49, %c0_50] : memref<8x32xf32, #tpu.memory_space<vmem>>, vector<8x32xf32>
      tpu.vector_store %arg14[%c0_49, %c0_50], %59 {strides = array<i32>} : memref<8x32xf32, #tpu.memory_space<vmem>>, vector<8x32xf32>,
    } else {
    }
    %c0 = arith.constant 0 : index
    %c0_1 = arith.constant 0 : index
    %c0_2 = arith.constant 0 : index
    %3 = vector.load %arg4[%c0, %c0_1, %c0_2] : memref<1x8x32xf32, #tpu.memory_space<vmem>>, vector<1x8x32xf32>
    %4 = vector.shape_cast %3 : vector<1x8x32xf32> to vector<8x32xf32>
    %c0_3 = arith.constant 0 : index
    %c0_4 = arith.constant 0 : index
    %5 = vector.load %arg8[%c0_3, %c0_4] : memref<32x64xf32, #tpu.memory_space<vmem>>, vector<32x64xf32>
    %cst = arith.constant dense<0.000000e+00> : vector<8x64xf32>
    %6 = tpu.matmul %4, %5, %cst {dimension_numbers = #tpu.dot_dimension_numbers<[1], [0], [0], [1], [0, 0, 1, 1], [], []>} : vector<8x32xf32>, vector<32x64xf32>, vector<8x64xf32> -> vector<8x64xf32>
    %c0_5 = arith.constant 0 : index
    %c0_6 = arith.constant 0 : index
    %7 = vector.load %arg9[%c0_5, %c0_6] : memref<1x64xf32, #tpu.memory_space<vmem>>, vector<1x64xf32>
    %8 = vector.broadcast %7 : vector<1x64xf32> to vector<8x64xf32>
    %9 = arith.addf %6, %8 : vector<8x64xf32>
    %10 = vector.extract_strided_slice %9 {offsets = [0, 0], sizes = [8, 32], strides = [1, 1]} : vector<8x64xf32> to vector<8x32xf32>
    %11 = vector.extract_strided_slice %9 {offsets = [0, 32], sizes = [8, 32], strides = [1, 1]} : vector<8x64xf32> to vector<8x32xf32>
    %c0_7 = arith.constant 0 : index
    %c0_8 = arith.constant 0 : index
    %12 = vector.load %arg13[%c0_7, %c0_8] : memref<8x32xf32, #tpu.memory_space<vmem>>, vector<8x32xf32>
    %cst_9 = arith.constant dense<0.000000e+00> : vector<8x8xf32>
    %13 = tpu.matmul %12, %10, %cst_9 {dimension_numbers = #tpu.dot_dimension_numbers<[1], [1], [0], [0], [0, 0, 1, 0], [], []>} : vector<8x32xf32>, vector<8x32xf32>, vector<8x8xf32> -> vector<8x8xf32>
    %c0_10 = arith.constant 0 : index
    %c0_11 = arith.constant 0 : index
    %c0_12 = arith.constant 0 : index
    %14 = vector.load %arg5[%c0_10, %c0_11, %c0_12] : memref<1x8x8xi8, #tpu.memory_space<vmem>>, vector<1x8x8xi8>
    %15 = vector.shape_cast %14 : vector<1x8x8xi8> to vector<8x8xi8>
    %c0_i8 = arith.constant 0 : i8
    %16 = vector.broadcast %c0_i8 : i8 to vector<8x8xi8>
    %17 = arith.cmpi ne, %15, %16 : vector<8x8xi8>
    %cst_13 = arith.constant -1.000000e+09 : f32
    %18 = vector.broadcast %cst_13 : f32 to vector<8x8xf32>
    %19 = arith.select %17, %18, %13 : vector<8x8xi1>, vector<8x8xf32>
    %c0_14 = arith.constant 0 : index
    %c0_15 = arith.constant 0 : index
    %20 = vector.load %arg11[%c0_14, %c0_15] : memref<8x1xf32, #tpu.memory_space<vmem>>, vector<8x1xf32>
    %cst_16 = arith.constant dense<0xFF800000> : vector<8xf32>
    %21 = vector.multi_reduction <maximumf>, %19, %cst_16 [1] : vector<8x8xf32> to vector<8xf32>
    %22 = vector.shape_cast %21 : vector<8xf32> to vector<8x1xf32>
    %23 = arith.maximumf %20, %22 : vector<8x1xf32>
    %24 = arith.subf %20, %23 : vector<8x1xf32>
    %25 = math.exp %24 : vector<8x1xf32>
    %26 = vector.broadcast %23 : vector<8x1xf32> to vector<8x8xf32>
    %27 = arith.subf %19, %26 : vector<8x8xf32>
    %28 = math.exp %27 : vector<8x8xf32>
    %c0_17 = arith.constant 0 : index
    %c0_18 = arith.constant 0 : index
    %29 = vector.load %arg12[%c0_17, %c0_18] : memref<8x1xf32, #tpu.memory_space<vmem>>, vector<8x1xf32>
    %30 = arith.mulf %25, %29 : vector<8x1xf32>
    %cst_19 = arith.constant dense<0.000000e+00> : vector<8xf32>
    %31 = vector.multi_reduction <add>, %28, %cst_19 [1] : vector<8x8xf32> to vector<8xf32>
    %32 = vector.shape_cast %31 : vector<8xf32> to vector<8x1xf32>
    %33 = arith.addf %30, %32 : vector<8x1xf32>
    %c0_20 = arith.constant 0 : index
    %c0_21 = arith.constant 0 : index
    %34 = vector.load %arg12[%c0_20, %c0_21] : memref<8x1xf32, #tpu.memory_space<vmem>>, vector<8x1xf32>
    tpu.vector_store %arg12[%c0_20, %c0_21], %33 {strides = array<i32>} : memref<8x1xf32, #tpu.memory_space<vmem>>, vector<8x1xf32>,
    %c0_22 = arith.constant 0 : index
    %c0_23 = arith.constant 0 : index
    %35 = vector.load %arg14[%c0_22, %c0_23] : memref<8x32xf32, #tpu.memory_space<vmem>>, vector<8x32xf32>
    %36 = vector.broadcast %25 : vector<8x1xf32> to vector<8x32xf32>
    %37 = arith.mulf %36, %35 : vector<8x32xf32>
    %cst_24 = arith.constant dense<0.000000e+00> : vector<8x32xf32>
    %38 = tpu.matmul %28, %11, %cst_24 {dimension_numbers = #tpu.dot_dimension_numbers<[1], [0], [0], [1], [0, 0, 1, 1], [], []>} : vector<8x8xf32>, vector<8x32xf32>, vector<8x32xf32> -> vector<8x32xf32>
    %39 = arith.addf %37, %38 : vector<8x32xf32>
    %c0_25 = arith.constant 0 : index
    %c0_26 = arith.constant 0 : index
    %40 = vector.load %arg14[%c0_25, %c0_26] : memref<8x32xf32, #tpu.memory_space<vmem>>, vector<8x32xf32>
    tpu.vector_store %arg14[%c0_25, %c0_26], %39 {strides = array<i32>} : memref<8x32xf32, #tpu.memory_space<vmem>>, vector<8x32xf32>,
    %c0_27 = arith.constant 0 : index
    %c0_28 = arith.constant 0 : index
    %41 = vector.load %arg11[%c0_27, %c0_28] : memref<8x1xf32, #tpu.memory_space<vmem>>, vector<8x1xf32>
    tpu.vector_store %arg11[%c0_27, %c0_28], %23 {strides = array<i32>} : memref<8x1xf32, #tpu.memory_space<vmem>>, vector<8x1xf32>,
    %c0_i32_29 = arith.constant 0 : i32
    %42 = arith.cmpi eq, %arg2, %c0_i32_29 : i32
    %43 = arith.extui %42 : i1 to i32
    %c0_i32_30 = arith.constant 0 : i32
    %44 = arith.cmpi ne, %43, %c0_i32_30 : i32
    scf.if %44 {
      %c0_31 = arith.constant 0 : index
      %c0_32 = arith.constant 0 : index
      %45 = vector.load %arg12[%c0_31, %c0_32] : memref<8x1xf32, #tpu.memory_space<vmem>>, vector<8x1xf32>
      %46 = tpu.reciprocal %45 {approx = true} : vector<8x1xf32> -> vector<8x1xf32>
      %c0_33 = arith.constant 0 : index
      %c0_34 = arith.constant 0 : index
      %47 = vector.load %arg14[%c0_33, %c0_34] : memref<8x32xf32, #tpu.memory_space<vmem>>, vector<8x32xf32>
      %48 = vector.broadcast %46 : vector<8x1xf32> to vector<8x32xf32>
      %49 = arith.mulf %47, %48 : vector<8x32xf32>
      %c0_35 = arith.constant 0 : index
      %c0_36 = arith.constant 0 : index
      %c0_37 = arith.constant 0 : index
      %50 = vector.load %arg10[%c0_35, %c0_36, %c0_37] : memref<1x8x32xf32, #tpu.memory_space<vmem>>, vector<1x8x32xf32>
      %51 = vector.shape_cast %50 : vector<1x8x32xf32> to vector<8x32xf32>
      %52 = vector.shape_cast %49 : vector<8x32xf32> to vector<1x8x32xf32>
      tpu.vector_store %arg10[%c0_35, %c0_36, %c0_37], %52 {strides = array<i32>} : memref<1x8x32xf32, #tpu.memory_space<vmem>>, vector<1x8x32xf32>,
    } else {
    }
    return
  }
  func.func @transform_0(%arg0: i32, %arg1: i32, %arg2: i32) -> (i32, i32, i32) {
    %c0_i32 = arith.constant 0 : i32
    %c0_i32_0 = arith.constant 0 : i32
    return %arg0, %arg1, %c0_i32 : i32, i32, i32
  }
  func.func @transform_1(%arg0: i32, %arg1: i32, %arg2: i32) -> (i32, i32, i32) {
    %c0_i32 = arith.constant 0 : i32
    %c0_i32_0 = arith.constant 0 : i32
    return %arg0, %arg2, %c0_i32 : i32, i32, i32
  }
  func.func @transform_2(%arg0: i32, %arg1: i32, %arg2: i32) -> (i32, i32, i32) {
    %c0_i32 = arith.constant 0 : i32
    return %arg0, %arg1, %arg2 : i32, i32, i32
  }
  func.func @transform_3(%arg0: i32, %arg1: i32, %arg2: i32) -> (i32, i32) {
    %c0_i32 = arith.constant 0 : i32
    %c0_i32_0 = arith.constant 0 : i32
    %c0_i32_1 = arith.constant 0 : i32
    return %c0_i32, %c0_i32_0 : i32, i32
  }
  func.func @transform_4(%arg0: i32, %arg1: i32, %arg2: i32) -> (i32, i32) {
    %c0_i32 = arith.constant 0 : i32
    %c0_i32_0 = arith.constant 0 : i32
    %c0_i32_1 = arith.constant 0 : i32
    return %c0_i32, %c0_i32_0 : i32, i32
  }
  func.func @transform_5(%arg0: i32, %arg1: i32, %arg2: i32) -> (i32, i32) {
    %c0_i32 = arith.constant 0 : i32
    %c0_i32_0 = arith.constant 0 : i32
    %c0_i32_1 = arith.constant 0 : i32
    return %c0_i32, %c0_i32_0 : i32, i32
  }
  func.func @transform_6(%arg0: i32, %arg1: i32, %arg2: i32) -> (i32, i32) {
    %c0_i32 = arith.constant 0 : i32
    %c0_i32_0 = arith.constant 0 : i32
    %c0_i32_1 = arith.constant 0 : i32
    return %c0_i32, %c0_i32_0 : i32, i32
  }
  func.func @transform_7(%arg0: i32, %arg1: i32, %arg2: i32) -> (i32, i32, i32) {
    %c0_i32 = arith.constant 0 : i32
    %c0_i32_0 = arith.constant 0 : i32
    return %arg0, %arg1, %c0_i32 : i32, i32, i32
  }
}

</mosaic_0001>

<bundles_post_ra>
// kernel: tpu_custom_call.1
= control target key start
LH: loop header
LB: loop body
LE: loop exit
PB: predicated region body
PF: predicated region fallthrough
CT: control target
= control target key end

     0   :  { %s1432_s0 = inlined_call_operand.hbm [shape: f32[2,8,32], index: 0, kind: input, shape index: {}]   ;;  %s1433_s1 = inlined_call_operand.hbm [shape: f32[2,8,32], index: 1, kind: input, shape index: {}]   ;;  %s1434_s2 = inlined_call_operand.hbm [shape: s8[2,8,8], index: 2, kind: input, shape index: {}]   ;;  %s1435_s3 = inlined_call_operand.hbm [shape: f32[32,32], index: 3, kind: input, shape index: {}]   ;;  %s1436_s4 = inlined_call_operand.vmem [shape: f32[1,32], index: 4, kind: input, shape index: {}]   ;;  %s1437_s5 = inlined_call_operand.hbm [shape: f32[32,64], index: 5, kind: input, shape index: {}]   ;;  %s1438_s6 = inlined_call_operand.vmem [shape: f32[1,64], index: 6, kind: input, shape index: {}]   ;;  %s1439_s7 = inlined_call_operand.hbm [shape: f32[2,8,32], index: 7, kind: output, shape index: {}]  }
   0x1   :  { %1451 = sst [smem:[#allocation27_spill]] %s1433_s1 }
   0x2   :  { %1452 = sst [smem:[#allocation28_spill]] %s1435_s3 }
   0x3   :  { %1453 = sst [smem:[#allocation29_spill]] %s1437_s5 }
   0x4   :  { %1454 = sst [smem:[#allocation30_spill]] %s1439_s7 }
   0x5   :  { %12 = vsyncpa [#allocation7], 0 }
   0x6   :  { %14 = vsyncpa [#allocation7 + $0x1], 0 }
   0x7   :  { %15 = vsyncpa [#allocation10], 0 }
   0x8   :  { %17 = vsyncpa [#allocation10 + $0x1], 0 }
   0x9   :  { %18 = vsyncpa [#allocation13], 0 }
   0xa   :  { %19 = vsyncpa [#allocation8], 0 }
   0xb   :  { %21 = vsyncpa [#allocation8 + $0x1], 0  ;;  %s1214_s24 = smov 0   ;;  %s1216_s25 = smov 0  }
   0xc   :  { %s1218_s26 = smov 0   ;;  %s1220_s27 = smov 0  }
   0xd   :  { %s1222_s28 = smov 0   ;;  %s1224_s29 = smov 0  }
   0xe LB: > { %1455 = sst [smem:[#allocation20_spill]] %s1144_s24  ;;  %s1245_s30 = sadd.s32 4294967295, %s1164_s29   ;;  %s1164_s29 = sphi %s1224_s29, %s27_s29   ;;  %s1160_s28 = sphi %s1222_s28, %s1486_s28   ;;  %s1156_s27 = sphi %s1220_s27, %s1485_s27   ;;  %s1152_s26 = sphi %s1218_s26, %s1481_s26   ;;  %s1148_s25 = sphi %s1216_s25, %s1484_s25   ;;  %s1144_s24 = sphi %s1214_s24, %s1483_s24  }
   0xf   : > { %1456 = sst [smem:[#allocation21_spill]] %s1152_s26  ;;  %p789_p0 = scmp.ge.s32.totalorder %s1164_s29, 1 }
  0x10   : > { %1457 = sst [smem:[#allocation22_spill]] %s1164_s29  ;;  %p69_p1 = scmp.eq.s32.totalorder %s1245_s30, 0 }
  0x11   : > { %p249_p2 = scmp.lt.s32.totalorder %s1164_s29, 3  ;;  %s1458_s3 = sld [smem:[#allocation28_spill]] }
  0x12   : > { %s1166_s12 = smov [#allocation12]   ;;  %s1440_s15 = smov 128  }
  0x13   : > { %p1253_p3 = pnand %p789_p0, %p249_p2  ;;  %s262_s13 = sshll.u32 %s1166_s12, 4  ;;  %s263_s13 = int_to_ptr.vmem [resolvable:$true] %s262_s13 }
  0x14   : > { %s1441_s16 = smov 8   ;;  %s788_s17 = sadd.s32 4294967294, %s1164_s29  }
  0x15   : > { %p831_p4 = pneg %p1253_p3  ;;  %s46_s18 = sadd.s32 1, %s1160_s28 }
  0x16   : > { %s55_s19 = sadd.s32 1, %s1152_s26  ;;  %p48_p7 = scmp.ge.s32.totalorder %s46_s18, 2 }
  0x17   : > { %s260_s10 = sshll.u32 %s1458_s3, 4  ;;  %p1261_p5 = pnand %p831_p4, %p69_p1  ;;  %s261_s10 = int_to_ptr.hbm [resolvable:$true] %s260_s10 }
  0x18   : > { %p62_p8 = scmp.ne.s32.totalorder %s1152_s26, %s1148_s25  ;;  %p63_p9 = scmp.eq.s32.totalorder %s1164_s29, 0 }
  0x19   : > { %834 = dma.hbm_to_vmem [thread:$0]  (!%p1261_p5), %s261_s10, 512, %s263_s13, [#allocation13], %s1440_s15, %s1440_s15, %s1441_s16  }
  0x1a   : > { %p68_p10 = scmp.ne.s32.totalorder %s1148_s25, %s1144_s24  ;;  %s1488_s18 = smov (%p48_p7, %s46_s18), 0 }
  0x1b   : > { %1461 = sst [smem:[#allocation23_spill]] %s1488_s18  ;;  %p1281_p11 = por %p63_p9, %p62_p8 }
  0x1c   : > { %p1287_p12 = por %p69_p1, %p68_p10  ;;  %s50_s22 = ssub.s32 %s1160_s28, %s1488_s18 }
  0x1d   : > { %p236_p13 = scmp.eq.s32.totalorder %s1245_s30, 1  ;;  %p53_p0 = scmp.eq.s32.totalorder %s50_s22, 0 }
  0x1e   : > { %p242_p2 = scmp.eq.s32.totalorder %s788_s17, 1  ;;  %p854_p7 = scmp.lt.s32.totalorder %s1164_s29, 2 }
  0x1f   : > { %p1294_p4 = por %p236_p13, %p62_p8  ;;  %s1307_s10 = sand.u32 1, %s1152_s26  }
  0x20   : > { %s1300_s8 = scalar_select %p53_p0, %s1152_s26, %s55_s19  }
  0x21   : > { %s1464_s23 = scalar_select %p1294_p4, 1, 0 }
  0x22   : > { %1466 = sst [smem:[#allocation25_spill]] %s1300_s8  ;;  %p1302_p9 = por %p242_p2, %p68_p10 }
  0x23   : > { %1465 = sst [smem:[#allocation24_spill]] %s1464_s23  ;;  %s793_s12 = sshll.u32 %s1307_s10, 3 }
  0x24   : > { %s1467_s9 = scalar_select %p1302_p9, 1, 0 }
  0x25   : > { %s794_s13 = sshll.u32 %s1160_s28, 3  ;;  %p1313_p6 = pnand %p854_p7, %p1281_p11 }
  0x26   : > { %1468 = sst [smem:[#allocation26_spill]] %s1467_s9  ;;  %s316_s22 = sand.u32 1, %s1164_s29  }
  0x27   : > { %s1470_s1 = sld [smem:[#allocation27_spill]]  ;;  %s320_s18 = scalar_lea.vmem [#allocation9], %s793_s12 }
  0x28   : > { %s329_s8 = sshll.u32 %s320_s18, 4  ;;  %s317_s26 = scalar_lea.sflag [#allocation10], %s316_s22  ;;  %s330_s8 = int_to_ptr.vmem [resolvable:$true] %s329_s8 }
  0x29   : > { %s1471_s5 = sld [smem:[#allocation29_spill]]  ;;  %s1169_s24 = smov [#allocation14]  }
  0x2a   : > { %s279_s15 = sshll.u32 %s1169_s24, 4  ;;  %s1473_s18 = smov 128   ;;  %s280_s15 = int_to_ptr.vmem [resolvable:$true] %s279_s15 }
  0x2b   : > { %s305_s22 = scalar_lea.hbm %s1432_s0, %s794_s13  ;;  %s297_s9 = scalar_lea.sflag [#allocation7], %s1307_s10 }
  0x2c   : > { %s797_s24 = sshll.u32 %s1307_s10, 1  ;;  %s798_s20 = sshll.u32 %s1160_s28, 1 }
  0x2d   : > { %s325_s16 = scalar_lea.hbm %s1470_s1, %s794_s13  ;;  %s346_s7 = scalar_lea.hbm %s1434_s2, %s798_s20 }
  0x2e   : > { %s327_s3 = sshll.u32 %s325_s16, 4  ;;  %s1472_s16 = smov 8   ;;  %s328_s3 = int_to_ptr.hbm [resolvable:$true] %s327_s3 }
  0x2f   : > { %844 = dma.hbm_to_vmem [thread:$0]  (!%p1313_p6), %s328_s3, 128, %s330_s8, %s317_s26  }
  0x30   : > { %s277_s29 = sshll.u32 %s1471_s5, 4  ;;  %s307_s3 = sshll.u32 %s305_s22, 4  ;;  %s278_s29 = int_to_ptr.hbm [resolvable:$true] %s277_s29  ;;  %s308_s3 = int_to_ptr.hbm [resolvable:$true] %s307_s3 }
  0x31   : > { %837 = dma.hbm_to_vmem [thread:$0]  (!%p1261_p5), %s278_s29, 512, %s280_s15, [#allocation13], %s1473_s18, %s1473_s18, %s1472_s16  }
  0x32   : > { %s300_s8 = scalar_lea.vmem [#allocation6], %s793_s12  ;;  %s348_s29 = sshll.u32 %s346_s7, 4  ;;  %s349_s29 = int_to_ptr.hbm [resolvable:$true] %s348_s29 }
  0x33   : > { %s309_s23 = sshll.u32 %s300_s8, 4  ;;  %s340_s15 = scalar_lea.vmem [#allocation11], %s797_s24  ;;  %s310_s23 = int_to_ptr.vmem [resolvable:$true] %s309_s23 }
  0x34   : > { %841 = dma.hbm_to_vmem [thread:$0]  (!%p1313_p6), %s308_s3, 128, %s310_s23, %s297_s9  }
  0x35   : > { %s350_s16 = sshll.u32 %s340_s15, 4  ;;  %359 = sbr.rel (%p1253_p3) target bundleno = 819 (0x333), region = 48  ;;  %s351_s16 = int_to_ptr.vmem [resolvable:$true] %s350_s16 }
  0x36   : > { %847 = dma.hbm_to_vmem [thread:$0]  (!%p1313_p6), %s349_s29, 32, %s351_s16, %s317_s26  }
  0x37   : > { %s1347_s1 = sand.u32 (!%p1253_p3), 1, %s1148_s25  }
  0x38   : > { %s1350_s23 = sshll.u32 (!%p1253_p3), %s1347_s1, 3  ;;  %s362_s5 = scalar_lea.sflag (!%p1253_p3), [#allocation7], %s1347_s1 }
  0x39   : > { %s365_s7 = scalar_lea.vmem (!%p1253_p3), [#allocation6], %s1350_s23 }
  0x3a   : > { %1127 = dma.done.wait (%p1287_p12), %s362_s5, 128  }
  0x3b   : > { %1129 = vsyncadd (%p1287_p12), %s362_s5, 4294967168  ;;  %s371_s26 = sand.u32 1, %s1245_s30   ;;  %s375_s10 = scalar_lea.vmem [#allocation9], %s1350_s23 }
  0x3c   : > { %s372_s11 = scalar_lea.sflag [#allocation10], %s371_s26 }
  0x3d   : > { %1131 = dma.done.wait (%p1287_p12), %s372_s11, 160  }
  0x3e   : > { %1133 = vsyncadd (%p1287_p12), %s372_s11, 4294967136  ;;  %s802_s12 = sshll.u32 %s1347_s1, 1 }
  0x3f   : > { %s1365_s13 = scalar_lea.vmem [#allocation11], %s802_s12 }
  0x40   : > { %1135 = dma.done.wait (%p69_p1), [#allocation13], 1024  }
  0x41   : > { %1137 = vsyncadd (%p69_p1), [#allocation13], 4294966272  ;;  %vm452_vm0 = vcmask 261120   ;;  %v1170_v0 = vmov 0.0   ;;  %v447_v1 = vld [vmem:[#allocation12 + $0x18] sm:$0xff]  ;;  %v446_v2 = vld [vmem:[#allocation12 + $0x10] sm:$0xff] }
  0x42   : > { %481 = vst.msk [vmem:[#allocation5] sm:$0xff] %vm452_vm0, %v1170_v0  ;;  %468 = vmatpush.msra.mxu0 %v447_v1  ;;  %v486_v3 = vld [vmem:[#allocation14 + $0x18] sm:$0xff]  ;;  %v445_v4 = vld [vmem:[#allocation12 + $0x8] sm:$0xff]  ;;  %v485_v5 = vld [vmem:[#allocation14 + $0x10] sm:$0xff]  ;;  %s1171_s19 = smov 96   ;;  %v1172_v19 = vmov 0  }
  0x43   : > { %507 = vmatpush.msra.mxu1 %v486_v3  ;;  %v484_v6 = vld [vmem:[#allocation14 + $0x8] sm:$0xff]  ;;  %v444_v7 = vld [vmem:[#allocation12] sm:$0xff]  ;;  %v916_v11 = vld [vmem:[%s1436_s4] ss:$0 sm:$0xff]  ;;  %914 = vset.pattern.permute.xlu0 %v1172_v19  ;;  %vm478_vm1 = vcmask 7168   ;;  %v1173_v20 = vmov -inf  }
  0x44   : > { %469 = vmatpush.msra.mxu0 %v446_v2  ;;  %v443_v8 = vld [vmem:[%s365_s7] sm:$0xff]  ;;  %v482_v10 = vld [vmem:[%s375_s10] sm:$0xff]  ;;  %915 = vset.pattern.permute.xlu2 %v1172_v19  ;;  %479 = vst.msk [vmem:[#allocation2] sm:$0xff] %vm478_vm1, %v1173_v20  ;;  %vm549_vm4 = vcmask 64512   ;;  %s812_s22 = sshll.u32 %s1156_s27, 3  ;;  %s1474_s9 = sld [smem:[#allocation30_spill]] }
  0x45   : > { %508 = vmatpush.msra.mxu1 %v485_v5  ;;  %v483_v9 = vld [vmem:[#allocation14] sm:$0xff]  ;;  %v917_v12 = vld [vmem:[%s1438_s6] ss:$0 sm:$0xff]  ;;  %480 = vst.msk [vmem:[#allocation3] sm:$0xff] %vm478_vm1, %v1170_v0  ;;  %s436_s14 = scalar_lea.vmem [#allocation15], %s1350_s23  ;;  %s623_s16 = scalar_lea.sflag [#allocation8], %s1347_s1 }
  0x46   : > { %470 = vmatpush.msra.mxu0 %v445_v4  ;;  %v542_v22 = vld [vmem:[%s1365_s13] sm:$0x3]  ;;  %s636_s29 = sshll.u32 %s436_s14, 4  ;;  %s637_s29 = int_to_ptr.vmem [resolvable:$true] %s636_s29 }
  0x47   : > { %509 = vmatpush.msra.mxu1 %v484_v6  ;;  %vm543_vm2 = vnez %v542_v22 }
  0x48   : > { %471 = vmatpush.msra.mxu0 %v444_v7  ;;  %v544_v23 = vsel %vm543_vm2, 16843009, %v1172_v19 }
  0x49   : > { %806 = vmatmul.msk.f32.vlgmr.msra.gmra.mxu0 %vm452_vm0, %v443_v8  ;;  %510 = vmatpush.msra.mxu1 %v483_v9  ;;  %v545_v24 = vunpack.c.0.s8 %v544_v23  ;;  %v573_v44 = vld [vmem:[#allocation5] sm:$0xff] }
  0x4a   : > { %807 = vmatmul.msk.f32.vlgmr.msra.gmra.mxu1 %vm452_vm0, %v482_v10  ;;  %s634_s20 = scalar_lea.hbm %s1474_s9, %s812_s22  ;;  %s1094_s23 = scalar_lea.hbm %s1474_s9, 16 }
  0x4b   : > { %vm546_vm3 = vcmp.ne.s32.totalorder %v545_v24, 0  ;;  %v548_v28 = vld [vmem:[#allocation2] sm:$0xff]  ;;  %s638_s15 = sshll.u32 %s634_s20, 4  ;;  %s639_s15 = int_to_ptr.hbm [resolvable:$true] %s638_s15 }
  0x4c   : > { %v565_v39 = vld [vmem:[#allocation3] sm:$0xff]  ;;  %s1088_s5 = sshra.s32 %s639_s15, 4  ;;  %s1089_s5 = int_to_ptr.hbm [resolvable:$true] %s1088_s5 }
  0x4d   : > { %s1090_s7 = scalar_lea.hbm %s1089_s5, 8  ;;  %p1095_p6 = scmp.lt.s32.totalorder %s1089_s5, %s1474_s9 }
  0x4e   : > { %p1091_p1 = scmp.ne.s32.totalorder %s1089_s5, %s1090_s7  ;;  %p1096_p8 = scmp.lt.s32.totalorder %s1094_s23, %s1090_s7 }
  0x50   : > { %p1092_p3 = pnand %p1091_p1, %p1294_p4  ;;  %p1097_p10 = por %p1096_p8, %p1095_p6 }
  0x52   : > { %p1093_p5 = pneg %p1092_p3 }
  0x54   : > { %p1098_p11 = pnand %p1097_p10, %p1093_p5 }
  0xc6   : > { %v473_v13 = vpop.f32.mrf.mxu0 }
  0xc7   : > { %v474_v14 = vadd.f32 %v916_v11, %v473_v13  ;;  %v512_v15 = vpop.f32.mrf.mxu1 }
  0xc8   : > { %v513_v16 = vadd.f32 %v917_v12, %v512_v15 }
  0xc9   : > { %v476_v17 = vmul.f32 0.35355338, %v474_v14 }
  0xca   : > { %580 = vrot.lane.b32.xlu1 %v513_v16, %s1171_s19  ;;  %808 = vmatpush.xpose.msk.msra.mxu2 %vm452_vm0, %v513_v16 }
  0xcb   : > { %477 = vst.msk [vmem:[#allocation4] sm:$0xff] %vm452_vm0, %v476_v17 }
  0xd2   : > { %v515_v18 = vld [vmem:[#allocation4] sm:$0xff] }
  0xd3   : > { %809 = vmatmul.msk.f32.vlgmr.msra.gmra.mxu2 %vm452_vm0, %v515_v18 }
 0x13c   : > { %v581_v21 = vpop.permute.xlu1 %580 }
 0x13d   : > { %601 = vmatpush.msra.mxu3 %v581_v21 }
 0x156   : > { %v539_v25 = vpop.f32.mrf.mxu2 }
 0x157   : > { %v547_v26 = vsel %vm546_vm3, -1e+09, %v539_v25 }
 0x158   : > { %v550_v27 = vsel %vm549_vm4, %v547_v26, -inf }
 0x159   : > { %551 = vmax.xlane.f32.xlu0 %v550_v27 }
 0x1cc   : > { %v552_v29 = vpop.xlane.xlu0 %551 }
 0x1cd   : > { %v553_v30 = vmax.f32 %v548_v28, %v552_v29 }
 0x1cf   : > { %v554_v31 = vsub.f32 %v548_v28, %v553_v30  ;;  %608 = vst.msk [vmem:[#allocation2] sm:$0xff] %vm478_vm1, %v553_v30  ;;  %559 = vperm.xlu0 %914, %v553_v30  }
 0x1d1   : > { %v555_v32 = vmul.f32 1.442695, %v554_v31 }
 0x1d3   : > { %918 = vpow2.f32 %v555_v32 }
 0x1d9   : > { %v919_v33 = vpop.eup %918 }
 0x1da   : > { %576 = vperm.xlu2 %915, %v919_v33   ;;  %v566_v40 = vmul.f32 %v919_v33, %v565_v39 }
 0x234   : > { %v577_v45 = vpop.permute.xlu2 %576 }
 0x235   : > { %v579_v46 = vmul.f32 %v577_v45, %v573_v44 }
 0x241   : > { %v560_v34 = vpop.permute.xlu0 %559 }
 0x242   : > { %v562_v35 = vsub.f32 %v547_v26, %v560_v34 }
 0x244   : > { %v563_v36 = vmul.f32 1.442695, %v562_v35 }
 0x246   : > { %920 = vpow2.f32 %v563_v36 }
 0x24c   : > { %v921_v37 = vpop.eup %920 }
 0x24d   : > { %810 = vmatmul.msk.f32.vlgmr.msra.gmra.mxu3 %vm549_vm4, %v921_v37  ;;  %v567_v38 = vsel %vm549_vm4, %v921_v37, 0.0 }
 0x24e   : > { %568 = vadd.xlane.f32.xlu1 %v567_v38 }
 0x2c1   : > { %v569_v41 = vpop.xlane.xlu1 %568 }
 0x2c2   : > { %v570_v42 = vadd.f32 %v569_v41, %v566_v40 }
 0x2c4   : > { %572 = vst.msk [vmem:[#allocation3] sm:$0xff] %vm478_vm1, %v570_v42 }
 0x2cb   : > { %v612_v43 = vld [vmem:[#allocation3] sm:$0xff] }
 0x2cc   : > { %922 = vrcp.f32 %v612_v43 }
 0x2d0   : > { %v603_v47 = vpop.f32.mrf.mxu3 }
 0x2d1   : > { %v606_v48 = vadd.f32 %v603_v47, %v579_v46 }
 0x2d2   : > { %v923_v49 = vpop.eup %922 }
 0x2d3   : > { %607 = vst.msk [vmem:[#allocation5] sm:$0xff] %vm452_vm0, %v606_v48  ;;  %617 = vperm.xlu2 %915, %v923_v49  }
 0x2da   : > { %v614_v50 = vld [vmem:[#allocation5] sm:$0xff] }
 0x32d   : > { %v618_v51 = vpop.permute.xlu2 %617 }
 0x32e   : > { %v620_v52 = vmul.f32 %v618_v51, %v614_v50 }
 0x330   : > { %621 = vst.msk [vmem:[%s436_s14] sm:$0xff] %vm452_vm0, %v620_v52 }
 0x331   : > { %1101 = shalt.err (!%p1098_p11)
}
 0x332   : > { %829 = dma.vmem_to_hbm [thread:$0]  (%p1294_p4), %s637_s29, 128, %s639_s15, %s623_s16  }
 0x333 PF: > { %s1476_s1 = sld [smem:[#allocation20_spill]] }
 0x334   : > { %s1478_s13 = sld [smem:[#allocation22_spill]] }
 0x339   : > { %s650_s30 = sand.u32 1, %s1476_s1  }
 0x33a   : > { %p1479_p12 = scmp.ge.s32.totalorder %s1478_s13, 2  ;;  %s651_s21 = scalar_lea.sflag [#allocation8], %s650_s30 }
 0x33c   : > { %p849_p13 = pnand %p1479_p12, %p1302_p9 }
 0x33e   : > { %p850_p0 = pneg %p849_p13 }
 0x340   : > { %1139 = dma.done.wait (%p850_p0), %s651_s21, 128  }
 0x341   : > { %1141 = vsyncadd (%p850_p0), %s651_s21, 4294967168  ;;  %s27_s29 = sadd.s32 1, %s1478_s13   ;;  %s1480_s17 = sld [smem:[#allocation21_spill]] }
 0x342   : > { %p24_p2 = scmp.ge.s32.totalorder %s27_s29, 4   ;;  %s1481_s26 = sld [smem:[#allocation25_spill]] }
 0x343   : > { %s1482_s18 = sld [smem:[#allocation23_spill]]  ;;  %s1483_s24 = smov %s1148_s25 }
 0x344   : > { %s1485_s27 = smov %s1160_s28 }
 0x345   :  { %26 = sbr.rel (!%p24_p2) target bundleno = 14 (0xe), region = 133 }
 0x347   : > { %s1484_s25 = smov %s1480_s17 }
 0x349   : > { %s1486_s28 = smov %s1482_s18 }
 0x34a   :  { %657 = vsyncpa [#allocation7], 1 }
 0x34b   :  { %659 = vsyncpa [#allocation7 + $0x1], 1 }
 0x34c   :  { %660 = vsyncpa [#allocation10], 1 }
 0x34d   :  { %662 = vsyncpa [#allocation10 + $0x1], 1 }
 0x34e   :  { %663 = vsyncpa [#allocation13], 1 }
 0x34f   :  { %664 = vsyncpa [#allocation8], 1 }
 0x350   :  { %666 = vsyncpa [#allocation8 + $0x1], 1 }

</bundles_post_ra>
